<compile_context>
chip_gen: v7x
topology: tpu7x:2x2x1
jax: 0.10.0
libtpu: 0.0.40
codegen_flags: <defaults>
</compile_context>

<pallas_src>
import functools

import jax
import jax.numpy as jnp
from jax.experimental import pallas as pl
from jax.experimental.pallas import tpu as pltpu


def _layernorm(x, gamma, beta, eps=1e-5):
    mu = jnp.mean(x, axis=-1, keepdims=True)
    var = jnp.mean((x - mu) ** 2, axis=-1, keepdims=True)
    return (x - mu) * jax.lax.rsqrt(var + eps) * gamma + beta


# ---------------- kernel 1: LayerNorm1 + fused Q/K/V projection -------------
def _qkv_kernel(x_ref, g1_ref, b1_ref, wqkv_ref, q_ref, k_ref, v_ref):
    x = x_ref[...].astype(jnp.float32)                          # (TN, C)
    xn = _layernorm(x, g1_ref[...], b1_ref[...]).astype(jnp.bfloat16)
    qkv = jnp.dot(xn, wqkv_ref[...],
                  preferred_element_type=jnp.float32)           # (TN, 3C) f32
    C = q_ref.shape[-1]
    q_ref[...] = qkv[:, 0 * C:1 * C].astype(q_ref.dtype)        # lane-dense stores
    k_ref[...] = qkv[:, 1 * C:2 * C].astype(k_ref.dtype)
    v_ref[...] = qkv[:, 2 * C:3 * C].astype(v_ref.dtype)


# -------- kernel 2: attention + proj + residual + LayerNorm2 + MLP ----------
def _attn_mlp_kernel(x_ref, q_ref, k_ref, v_ref, wo_ref, bo_ref,
                     g2_ref, b2_ref, w1_ref, bb1_ref, w2_ref, bb2_ref,
                     out_ref, o_scratch, *, num_heads, scale):
    x = x_ref[...].astype(jnp.float32)                          # (TQ, C)
    q = q_ref[...]                                              # (TQ, C) bf16
    k = k_ref[...]                                              # (N,  C) bf16
    v = v_ref[...]                                              # (N,  C) bf16
    C = q.shape[-1]
    d = C // num_heads

    # Heads via static lane slices of lane-dense (·, C) operands.
    # NOTE: for very large head counts (>=12) a lax.fori_loop over heads would
    # bound live ranges better; a static loop is fine here.
    for h in range(num_heads):
        sl = slice(h * d, (h + 1) * d)
        s = jax.lax.dot_general(q[:, sl], k[:, sl],
                                (((1,), (1,)), ((), ())),
                                preferred_element_type=jnp.float32)   # (TQ, N)
        s = s * scale
        s = s - jnp.max(s, axis=-1, keepdims=True)
        p = jnp.exp(s)
        p = p / jnp.sum(p, axis=-1, keepdims=True)
        oh = jnp.dot(p.astype(jnp.bfloat16), v[:, sl],
                     preferred_element_type=jnp.float32)              # (TQ, d)
        o_scratch[:, sl] = oh

    # One full-depth (TQ,C)@(C,C) projection instead of H shallow K=d matmuls.
    attn_out = jnp.dot(o_scratch[...].astype(jnp.bfloat16), wo_ref[...],
                       preferred_element_type=jnp.float32) + bo_ref[...]
    acc = x + attn_out                                          # residual 1

    xn2 = _layernorm(acc, g2_ref[...], b2_ref[...]).astype(jnp.bfloat16)
    h1 = jnp.dot(xn2, w1_ref[...],
                 preferred_element_type=jnp.float32) + bb1_ref[...]
    h1 = jax.nn.gelu(h1, approximate=False)                     # torch.nn.GELU (exact)
    out = acc + jnp.dot(h1.astype(jnp.bfloat16), w2_ref[...],
                        preferred_element_type=jnp.float32) + bb2_ref[...]
    out_ref[...] = out.astype(out_ref.dtype)                    # residual 2


# ----------------------------- helpers --------------------------------------
def _const_spec(shape):
    """BlockSpec for a grid-invariant operand; single-buffered when supported."""
    idx = lambda b, i: (0,) * len(shape)
    try:
        return pl.BlockSpec(shape, idx, pipeline_mode=pl.Buffered(1))
    except Exception:  # older JAX without pipeline_mode / Buffered
        return pl.BlockSpec(shape, idx)


def _vmem_caps():
    cap = 128 * 1024 * 1024
    try:
        cap = int(getattr(pltpu.get_tpu_info(), "vmem_capacity_bytes", cap))
    except Exception:
        pass
    limit = min(max(cap - 16 * 1024 * 1024, 32 * 1024 * 1024), 100 * 1024 * 1024)
    tn_target = 128 if cap <= 64 * 1024 * 1024 else 256   # v7x vs v5e/v6e
    return limit, tn_target


def _round_up(n, m):
    return ((n + m - 1) // m) * m


# ------------------------------ wrapper --------------------------------------
def block_forward(x, params, num_heads):
    B, N, C = x.shape
    assert C % num_heads == 0
    d = C // num_heads
    HM = params["w1"].shape[1]
    scale = d ** (-0.5)
    bf16 = jnp.bfloat16

    # Weights -> bf16 once (outside the grid loop); Q/K/V fused along lanes.
    wqkv = jnp.concatenate(
        [params["wq"], params["wk"], params["wv"]], axis=1).astype(bf16)  # (C, 3C)
    wo = params["wo"].astype(bf16)                                        # (C, C)
    w1 = params["w1"].astype(bf16)                                        # (C, HM)
    w2 = params["w2"].astype(bf16)                                        # (HM, C)

    vmem_limit, tn_target = _vmem_caps()
    TN = min(tn_target, _round_up(N, 8))
    nt = pl.cdiv(N, TN)

    cparams = pltpu.CompilerParams(
        dimension_semantics=("parallel", "parallel"),
        vmem_limit_bytes=vmem_limit)

    # ---------------- pass 1: LN1 + fused QKV (sequence-tiled) --------------
    q, k, v = pl.pallas_call(
        _qkv_kernel,
        out_shape=(jax.ShapeDtypeStruct((B, N, C), bf16),) * 3,
        grid_spec=pltpu.PrefetchScalarGridSpec(
            num_scalar_prefetch=0,
            grid=(B, nt),
            in_specs=[
                pl.BlockSpec((None, TN, C), lambda b, i: (b, i, 0)),   # x tile
                _const_spec((1, C)), _const_spec((1, C)),              # ln1 g/b
                _const_spec((C, 3 * C)),                               # W_qkv
            ],
            out_specs=[pl.BlockSpec((None, TN, C), lambda b, i: (b, i, 0))] * 3,
        ),
        compiler_params=cparams,
    )(x, params["g1"], params["b1"], wqkv)

    # --------- pass 2: attention + proj + res + LN2 + MLP + res -------------
    kernel_b = functools.partial(_attn_mlp_kernel,
                                 num_heads=num_heads, scale=scale)
    # TODO(synk): for very long sequences on v7x, stream K/V over a third grid
    # axis with online softmax instead of keeping them full-resident per batch.
    return pl.pallas_call(
        kernel_b,
        out_shape=jax.ShapeDtypeStruct((B, N, C), x.dtype),
        grid_spec=pltpu.PrefetchScalarGridSpec(
            num_scalar_prefetch=0,
            grid=(B, nt),
            in_specs=[
                pl.BlockSpec((None, TN, C), lambda b, i: (b, i, 0)),   # x (residual)
                pl.BlockSpec((None, TN, C), lambda b, i: (b, i, 0)),   # q tile
                pl.BlockSpec((None, N, C), lambda b, i: (b, 0, 0)),    # k (full seq)
                pl.BlockSpec((None, N, C), lambda b, i: (b, 0, 0)),    # v (full seq)
                _const_spec((C, C)),                                   # Wo
                _const_spec((1, C)),                                   # bo
                _const_spec((1, C)), _const_spec((1, C)),              # ln2 g/b
                _const_spec((C, HM)), _const_spec((1, HM)),            # fc1
                _const_spec((HM, C)), _const_spec((1, C)),             # fc2
            ],
            out_specs=pl.BlockSpec((None, TN, C), lambda b, i: (b, i, 0)),
            scratch_shapes=[pltpu.VMEM((TN, C), jnp.float32)],         # head outputs
        ),
        compiler_params=cparams,
    )(x, q, k, v, wo, params["bo"], params["g2"], params["b2"],
      w1, params["bb1"], w2, params["bb2"])


# -------------------- pure-JAX reference (for verification) ----------------
def block_reference(x, params, num_heads):
    B, N, C = x.shape
    d = C // num_heads
    scale = d ** (-0.5)

    def ln(v, g, b):
        mu = jnp.mean(v, axis=-1, keepdims=True)
        var = jnp.mean((v - mu) ** 2, axis=-1, keepdims=True)
        return (v - mu) * jax.lax.rsqrt(var + 1e-5) * g[0] + b[0]

    xn = ln(x, params["g1"], params["b1"])
    q = xn @ params["wq"]
    k = xn @ params["wk"]
    v = xn @ params["wv"]
    q = q.reshape(B, N, num_heads, d).transpose(0, 2, 1, 3)
    k = k.reshape(B, N, num_heads, d).transpose(0, 2, 1, 3)
    v = v.reshape(B, N, num_heads, d).transpose(0, 2, 1, 3)
    attn = jnp.einsum("bhnd,bhmd->bhnm", q, k) * scale
    attn = jax.nn.softmax(attn, axis=-1)
    o = jnp.einsum("bhnm,bhmd->bhnd", attn, v)
    o = o.transpose(0, 2, 1, 3).reshape(B, N, C)
    o = o @ params["wo"] + params["bo"][0]
    x = x + o
    xn2 = ln(x, params["g2"], params["b2"])
    hmid = jax.nn.gelu(xn2 @ params["w1"] + params["bb1"][0], approximate=False)
    return x + (hmid @ params["w2"] + params["bb2"][0])


if __name__ == "__main__":
    B, N, C = 2, 8, 32
    num_heads = 4
    H = int(C * 4.0)                 # mlp_ratio = 4.0

    key = jax.random.PRNGKey(0)
    ks = jax.random.split(key, 16)

    def rnd(k, shape, s=0.1):
        return jax.random.normal(k, shape, dtype=jnp.float32) * s

    params = {
        "g1":  jnp.ones((1, C), jnp.float32),
        "b1":  jnp.zeros((1, C), jnp.float32),
        "wq":  rnd(ks[0], (C, C)),
        "wk":  rnd(ks[1], (C, C)),
        "wv":  rnd(ks[2], (C, C)),
        "wo":  rnd(ks[3], (C, C)),
        "bo":  rnd(ks[4], (1, C), 0.02),
        "g2":  jnp.ones((1, C), jnp.float32),
        "b2":  jnp.zeros((1, C), jnp.float32),
        "w1":  rnd(ks[5], (C, H)),
        "bb1": rnd(ks[6], (1, H), 0.02),
        "w2":  rnd(ks[7], (H, C)),
        "bb2": rnd(ks[8], (1, C), 0.02),
    }

    x = jax.random.normal(ks[9], (B, N, C), dtype=jnp.float32)

    out = jax.block_until_ready(block_forward(x, params, num_heads))
    ref = block_reference(x, params, num_heads)
    assert out.shape == (B, N, C)
    max_err = float(jnp.max(jnp.abs(out - ref)))
    # bf16 matmuls -> tolerance looser than a pure-f32 kernel
    assert jnp.allclose(out, ref, atol=3e-2, rtol=3e-2), \
        f"mismatch vs reference (max abs err {max_err})"

    print("KERNEL_OK")
</pallas_src>

<mosaic_0001>
module attributes {stable_mosaic.version = 11 : i64} {
  func.func @_qkv_kernel(%arg0: i32, %arg1: i32, %arg2: memref<1x8x32xf32, #tpu.memory_space<vmem>>, %arg3: memref<1x32xf32, #tpu.memory_space<vmem>>, %arg4: memref<1x32xf32, #tpu.memory_space<vmem>>, %arg5: memref<32x96xbf16, #tpu.memory_space<vmem>>, %arg6: memref<1x8x32xbf16, #tpu.memory_space<vmem>>, %arg7: memref<1x8x32xbf16, #tpu.memory_space<vmem>>, %arg8: memref<1x8x32xbf16, #tpu.memory_space<vmem>>) attributes {dimension_semantics = [#tpu.dimension_semantics<parallel>, #tpu.dimension_semantics<parallel>], iteration_bounds = array<i64: 2, 1>, scalar_prefetch = 0 : i64, scratch_operands = 0 : i64, tpu.core_type = #tpu.core_type<tc>, window_params = [{transform_indices = @transform_0, window_bounds = array<i64: 1, 8, 32>}, {pipeline_mode = #tpu.pipeline_mode<synchronous>, transform_indices = @transform_1, window_bounds = array<i64: 1, 32>}, {pipeline_mode = #tpu.pipeline_mode<synchronous>, transform_indices = @transform_2, window_bounds = array<i64: 1, 32>}, {pipeline_mode = #tpu.pipeline_mode<synchronous>, transform_indices = @transform_3, window_bounds = array<i64: 32, 96>}, {transform_indices = @transform_4, window_bounds = array<i64: 1, 8, 32>}, {transform_indices = @transform_5, window_bounds = array<i64: 1, 8, 32>}, {transform_indices = @transform_6, window_bounds = array<i64: 1, 8, 32>}]} {
    %c0 = arith.constant 0 : index
    %c0_0 = arith.constant 0 : index
    %c0_1 = arith.constant 0 : index
    %0 = vector.load %arg2[%c0, %c0_0, %c0_1] : memref<1x8x32xf32, #tpu.memory_space<vmem>>, vector<1x8x32xf32>
    %1 = vector.shape_cast %0 : vector<1x8x32xf32> to vector<8x32xf32>
    %c0_2 = arith.constant 0 : index
    %c0_3 = arith.constant 0 : index
    %2 = vector.load %arg3[%c0_2, %c0_3] : memref<1x32xf32, #tpu.memory_space<vmem>>, vector<1x32xf32>
    %c0_4 = arith.constant 0 : index
    %c0_5 = arith.constant 0 : index
    %3 = vector.load %arg4[%c0_4, %c0_5] : memref<1x32xf32, #tpu.memory_space<vmem>>, vector<1x32xf32>
    %cst = arith.constant dense<0.000000e+00> : vector<8xf32>
    %4 = vector.multi_reduction <add>, %1, %cst [1] : vector<8x32xf32> to vector<8xf32>
    %5 = vector.shape_cast %4 : vector<8xf32> to vector<8x1xf32>
    %cst_6 = arith.constant 3.200000e+01 : f32
    %6 = vector.broadcast %cst_6 : f32 to vector<8x1xf32>
    %7 = arith.divf %5, %6 : vector<8x1xf32>
    %8 = vector.broadcast %7 : vector<8x1xf32> to vector<8x32xf32>
    %9 = arith.subf %1, %8 : vector<8x32xf32>
    %10 = arith.mulf %9, %9 : vector<8x32xf32>
    %cst_7 = arith.constant dense<0.000000e+00> : vector<8xf32>
    %11 = vector.multi_reduction <add>, %10, %cst_7 [1] : vector<8x32xf32> to vector<8xf32>
    %12 = vector.shape_cast %11 : vector<8xf32> to vector<8x1xf32>
    %cst_8 = arith.constant 3.200000e+01 : f32
    %13 = vector.broadcast %cst_8 : f32 to vector<8x1xf32>
    %14 = arith.divf %12, %13 : vector<8x1xf32>
    %15 = vector.broadcast %7 : vector<8x1xf32> to vector<8x32xf32>
    %16 = arith.subf %1, %15 : vector<8x32xf32>
    %cst_9 = arith.constant 9.99999974E-6 : f32
    %17 = vector.broadcast %cst_9 : f32 to vector<8x1xf32>
    %18 = arith.addf %14, %17 : vector<8x1xf32>
    %19 = math.rsqrt %18 : vector<8x1xf32>
    %20 = vector.broadcast %19 : vector<8x1xf32> to vector<8x32xf32>
    %21 = arith.mulf %16, %20 : vector<8x32xf32>
    %22 = vector.broadcast %2 : vector<1x32xf32> to vector<8x32xf32>
    %23 = arith.mulf %21, %22 : vector<8x32xf32>
    %24 = vector.broadcast %3 : vector<1x32xf32> to vector<8x32xf32>
    %25 = arith.addf %23, %24 : vector<8x32xf32>
    %26 = arith.truncf %25 : vector<8x32xf32> to vector<8x32xbf16>
    %c0_10 = arith.constant 0 : index
    %c0_11 = arith.constant 0 : index
    %27 = vector.load %arg5[%c0_10, %c0_11] : memref<32x96xbf16, #tpu.memory_space<vmem>>, vector<32x96xbf16>
    %cst_12 = arith.constant dense<0.000000e+00> : vector<8x96xf32>
    %28 = tpu.matmul %26, %27, %cst_12 {dimension_numbers = #tpu.dot_dimension_numbers<[1], [0], [0], [1], [0, 0, 1, 1], [], []>} : vector<8x32xbf16>, vector<32x96xbf16>, vector<8x96xf32> -> vector<8x96xf32>
    %29 = vector.extract_strided_slice %28 {offsets = [0, 0], sizes = [8, 32], strides = [1, 1]} : vector<8x96xf32> to vector<8x32xf32>
    %30 = arith.truncf %29 : vector<8x32xf32> to vector<8x32xbf16>
    %c0_13 = arith.constant 0 : index
    %c0_14 = arith.constant 0 : index
    %c0_15 = arith.constant 0 : index
    %31 = vector.load %arg6[%c0_13, %c0_14, %c0_15] : memref<1x8x32xbf16, #tpu.memory_space<vmem>>, vector<1x8x32xbf16>
    %32 = vector.shape_cast %31 : vector<1x8x32xbf16> to vector<8x32xbf16>
    %33 = vector.shape_cast %30 : vector<8x32xbf16> to vector<1x8x32xbf16>
    tpu.vector_store %arg6[%c0_13, %c0_14, %c0_15], %33 {strides = array<i32>} : memref<1x8x32xbf16, #tpu.memory_space<vmem>>, vector<1x8x32xbf16>,
    %34 = vector.extract_strided_slice %28 {offsets = [0, 32], sizes = [8, 32], strides = [1, 1]} : vector<8x96xf32> to vector<8x32xf32>
    %35 = arith.truncf %34 : vector<8x32xf32> to vector<8x32xbf16>
    %c0_16 = arith.constant 0 : index
    %c0_17 = arith.constant 0 : index
    %c0_18 = arith.constant 0 : index
    %36 = vector.load %arg7[%c0_16, %c0_17, %c0_18] : memref<1x8x32xbf16, #tpu.memory_space<vmem>>, vector<1x8x32xbf16>
    %37 = vector.shape_cast %36 : vector<1x8x32xbf16> to vector<8x32xbf16>
    %38 = vector.shape_cast %35 : vector<8x32xbf16> to vector<1x8x32xbf16>
    tpu.vector_store %arg7[%c0_16, %c0_17, %c0_18], %38 {strides = array<i32>} : memref<1x8x32xbf16, #tpu.memory_space<vmem>>, vector<1x8x32xbf16>,
    %39 = vector.extract_strided_slice %28 {offsets = [0, 64], sizes = [8, 32], strides = [1, 1]} : vector<8x96xf32> to vector<8x32xf32>
    %40 = arith.truncf %39 : vector<8x32xf32> to vector<8x32xbf16>
    %c0_19 = arith.constant 0 : index
    %c0_20 = arith.constant 0 : index
    %c0_21 = arith.constant 0 : index
    %41 = vector.load %arg8[%c0_19, %c0_20, %c0_21] : memref<1x8x32xbf16, #tpu.memory_space<vmem>>, vector<1x8x32xbf16>
    %42 = vector.shape_cast %41 : vector<1x8x32xbf16> to vector<8x32xbf16>
    %43 = vector.shape_cast %40 : vector<8x32xbf16> to vector<1x8x32xbf16>
    tpu.vector_store %arg8[%c0_19, %c0_20, %c0_21], %43 {strides = array<i32>} : memref<1x8x32xbf16, #tpu.memory_space<vmem>>, vector<1x8x32xbf16>,
    return
  }
  func.func @transform_0(%arg0: i32, %arg1: i32) -> (i32, i32, i32) {
    %c0_i32 = arith.constant 0 : i32
    %c0_i32_0 = arith.constant 0 : i32
    return %arg0, %arg1, %c0_i32 : i32, i32, i32
  }
  func.func @transform_1(%arg0: i32, %arg1: i32) -> (i32, i32) {
    %c0_i32 = arith.constant 0 : i32
    %c0_i32_0 = arith.constant 0 : i32
    %c0_i32_1 = arith.constant 0 : i32
    return %c0_i32, %c0_i32_0 : i32, i32
  }
  func.func @transform_2(%arg0: i32, %arg1: i32) -> (i32, i32) {
    %c0_i32 = arith.constant 0 : i32
    %c0_i32_0 = arith.constant 0 : i32
    %c0_i32_1 = arith.constant 0 : i32
    return %c0_i32, %c0_i32_0 : i32, i32
  }
  func.func @transform_3(%arg0: i32, %arg1: i32) -> (i32, i32) {
    %c0_i32 = arith.constant 0 : i32
    %c0_i32_0 = arith.constant 0 : i32
    %c0_i32_1 = arith.constant 0 : i32
    return %c0_i32, %c0_i32_0 : i32, i32
  }
  func.func @transform_4(%arg0: i32, %arg1: i32) -> (i32, i32, i32) {
    %c0_i32 = arith.constant 0 : i32
    %c0_i32_0 = arith.constant 0 : i32
    return %arg0, %arg1, %c0_i32 : i32, i32, i32
  }
  func.func @transform_5(%arg0: i32, %arg1: i32) -> (i32, i32, i32) {
    %c0_i32 = arith.constant 0 : i32
    %c0_i32_0 = arith.constant 0 : i32
    return %arg0, %arg1, %c0_i32 : i32, i32, i32
  }
  func.func @transform_6(%arg0: i32, %arg1: i32) -> (i32, i32, i32) {
    %c0_i32 = arith.constant 0 : i32
    %c0_i32_0 = arith.constant 0 : i32
    return %arg0, %arg1, %c0_i32 : i32, i32, i32
  }
}

</mosaic_0001>

<bundles_post_ra>
// kernel: tpu_custom_call.1
= control target key start
LH: loop header
LB: loop body
LE: loop exit
PB: predicated region body
PF: predicated region fallthrough
CT: control target
= control target key end

     0   :  { %12 = vsyncpa [#allocation3], 0  ;;  %s1506_s0 = inlined_call_operand.hbm [shape: f32[2,8,32], index: 0, kind: input, shape index: {}]   ;;  %s1507_s1 = inlined_call_operand.hbm [shape: f32[1,32], index: 1, kind: input, shape index: {}]   ;;  %s1508_s2 = inlined_call_operand.hbm [shape: f32[1,32], index: 2, kind: input, shape index: {}]   ;;  %s1509_s3 = inlined_call_operand.hbm [shape: bf16[32,96], index: 3, kind: input, shape index: {}]   ;;  %s1510_s4 = inlined_call_operand.hbm [shape: bf16[2,8,32], index: 4, kind: output, shape index: {0}]   ;;  %s1511_s5 = inlined_call_operand.hbm [shape: bf16[2,8,32], index: 5, kind: output, shape index: {1}]   ;;  %s1512_s6 = inlined_call_operand.hbm [shape: bf16[2,8,32], index: 6, kind: output, shape index: {2}]  }
   0x1   :  { %14 = vsyncpa [#allocation3 + $0x1], 0 }
   0x2   :  { %15 = vsyncpa [#allocation6], 0 }
   0x3   :  { %16 = vsyncpa [#allocation9], 0 }
   0x4   :  { %17 = vsyncpa [#allocation4], 0 }
   0x5   :  { %19 = vsyncpa [#allocation4 + $0x1], 0 }
   0x6   :  { %20 = vsyncpa [#allocation12], 0 }
   0x7   :  { %22 = vsyncpa [#allocation12 + $0x1], 0  ;;  %s1148_s21 = smov 0   ;;  %s1150_s22 = smov 0  }
   0x8   :  { %s1152_s23 = smov 0   ;;  %s1154_s24 = smov 0  }
   0x9   :  { %s1156_s25 = smov 0   ;;  %s1158_s26 = smov 0  }
   0xa LB: > { %s1179_s27 = sadd.s32 4294967295, %s1098_s26   ;;  %s1516_s28 = sadd.s32 4294967294, %s1098_s26   ;;  %s1098_s26 = sphi %s1158_s26, %s28_s26   ;;  %s1094_s25 = sphi %s1156_s25, %s1538_s25   ;;  %s1090_s24 = sphi %s1154_s24, %s1537_s24   ;;  %s1086_s23 = sphi %s1152_s23, %s1536_s23   ;;  %s1082_s22 = sphi %s1150_s22, %s1535_s22   ;;  %s1078_s21 = sphi %s1148_s21, %s1534_s21  }
   0xb   : > { %p62_p0 = scmp.ne.s32.totalorder %s1082_s22, %s1078_s21  ;;  %p1513_p1 = scmp.eq.s32.totalorder %s1179_s27, 0 }
   0xc   : > { %p157_p3 = scmp.eq.s32.totalorder %s1516_s28, 1  ;;  %p680_p5 = scmp.ge.s32.totalorder %s1098_s26, 1 }
   0xd   : > { %p1190_p4 = por %p1513_p1, %p62_p0  ;;  %p220_p7 = scmp.lt.s32.totalorder %s1098_s26, 3 }
   0xe   : > { %p1195_p6 = por %p157_p3, %p62_p0  ;;  %s1100_s8 = smov [#allocation5]  }
   0xf   : > { %s1517_s29 = scalar_select %p1190_p4, 1, 0 }
  0x10   : > { %s1518_s30 = scalar_select %p1195_p6, 1, 0 }
  0x11   : > { %p1200_p8 = pnand %p680_p5, %p220_p7  ;;  %s233_s9 = sshll.u32 %s1100_s8, 4  ;;  %s234_s9 = int_to_ptr.vmem [resolvable:$true] %s233_s9 }
  0x12   : > { %s1101_s10 = smov [#allocation7]   ;;  %s1102_s13 = smov [#allocation8]  }
  0x13   : > { %s1519_s7 = scalar_select %p1200_p8, 1, 0 }
  0x14   : > { %p741_p10 = pneg %p1200_p8  ;;  %s244_s11 = sshll.u32 %s1101_s10, 4  ;;  %s1213_s11 = int_to_ptr.vmem [resolvable:$true] %s244_s11 }
  0x15   : > { %s254_s14 = sshll.u32 %s1102_s13, 4  ;;  %s834_s17 = scalar_lea.hbm %s1507_s1, 16  ;;  %s1215_s14 = int_to_ptr.vmem [resolvable:$true] %s254_s14 }
  0x16   : > { %p1209_p11 = pnand %p741_p10, %p1513_p1  ;;  %p835_p12 = scmp.ne.s32.totalorder %s1507_s1, %s834_s17 }
  0x17   : > { %p841_p5 = scmp.lt.u32.totalorder %s834_s17, %s1507_s1 }
  0x18   : > { %p1225_p13 = pneg %p1209_p11 }
  0x1a   : > { %p837_p0 = pnand %p1225_p13, %p835_p12 }
  0x1c   : > { %p838_p3 = pneg %p837_p0 }
  0x1e   : > { %p843_p7 = pnand %p841_p5, %p838_p3 }
  0x20   : > { %846 = shalt.err (!%p843_p7)
}
  0x21   : > { %s847_s13 = scalar_lea.vmem %s234_s9, 16  ;;  %s854_s15 = scalar_lea.vmem %s234_s9, 32 }
  0x22   : > { %p848_p10 = scmp.ne.s32.totalorder %s234_s9, %s847_s13  ;;  %p855_p2 = scmp.lt.s32.totalorder %s234_s9, %s234_s9 }
  0x23   : > { %p856_p6 = scmp.lt.s32.totalorder %s854_s15, %s847_s13 }
  0x24   : > { %p850_p9 = pnand %p848_p10, %p1225_p13 }
  0x25   : > { %p857_p4 = por %p856_p6, %p855_p2 }
  0x26   : > { %p851_p1 = pneg %p850_p9 }
  0x28   : > { %p858_p8 = pnand %p857_p4, %p851_p1 }
  0x2a   : > { %861 = shalt.err (!%p858_p8)
}
  0x2b   : > { %744 = dma.hbm_to_vmem [thread:$0]  (!%p1209_p11), %s1507_s1, 16, %s234_s9, [#allocation6]  }
  0x2c   : > { %s862_s8 = scalar_lea.hbm %s1508_s2, 16 }
  0x2d   : > { %p863_p9 = scmp.ne.s32.totalorder %s1508_s2, %s862_s8  ;;  %p869_p1 = scmp.lt.u32.totalorder %s862_s8, %s1508_s2 }
  0x2f   : > { %p865_p12 = pnand %p863_p9, %p1225_p13 }
  0x31   : > { %p866_p2 = pneg %p865_p12 }
  0x33   : > { %p871_p4 = pnand %p869_p1, %p866_p2 }
  0x35   : > { %874 = shalt.err (!%p871_p4)
}
  0x36   : > { %s875_s9 = scalar_lea.vmem %s1213_s11, 16  ;;  %s882_s28 = scalar_lea.vmem %s1213_s11, 32 }
  0x37   : > { %p876_p6 = scmp.ne.s32.totalorder %s1213_s11, %s875_s9  ;;  %p883_p3 = scmp.lt.s32.totalorder %s1213_s11, %s1213_s11 }
  0x38   : > { %p884_p5 = scmp.lt.s32.totalorder %s882_s28, %s875_s9 }
  0x39   : > { %p878_p8 = pnand %p876_p6, %p1225_p13 }
  0x3a   : > { %p885_p7 = por %p884_p5, %p883_p3 }
  0x3b   : > { %p879_p0 = pneg %p878_p8 }
  0x3d   : > { %p886_p10 = pnand %p885_p7, %p879_p0 }
  0x3f   : > { %889 = shalt.err (!%p886_p10)
}
  0x40   : > { %747 = dma.hbm_to_vmem [thread:$0]  (!%p1209_p11), %s1508_s2, 16, %s1213_s11, [#allocation6]  }
  0x41   : > { %s890_s8 = scalar_lea.hbm %s1509_s3, 256 }
  0x42   : > { %p891_p9 = scmp.ne.s32.totalorder %s1509_s3, %s890_s8  ;;  %p897_p1 = scmp.lt.u32.totalorder %s890_s8, %s1509_s3 }
  0x44   : > { %p893_p12 = pnand %p891_p9, %p1225_p13 }
  0x46   : > { %p894_p2 = pneg %p893_p12 }
  0x48   : > { %p899_p4 = pnand %p897_p1, %p894_p2 }
  0x4a   : > { %902 = shalt.err (!%p899_p4)
}
  0x4b   : > { %s903_s11 = scalar_lea.vmem %s1215_s14, 256  ;;  %p911_p3 = scmp.lt.s32.totalorder %s1215_s14, %s1215_s14 }
  0x4c   : > { %p904_p6 = scmp.ne.s32.totalorder %s1215_s14, %s903_s11  ;;  %p912_p5 = scmp.lt.s32.totalorder %s903_s11, %s903_s11 }
  0x4e   : > { %p906_p8 = pnand %p904_p6, %p1225_p13  ;;  %p913_p7 = por %p912_p5, %p911_p3 }
  0x50   : > { %p907_p0 = pneg %p906_p8 }
  0x52   : > { %p914_p10 = pnand %p913_p7, %p907_p0 }
  0x54   : > { %917 = shalt.err (!%p914_p10)
}
  0x55   : > { %s1103_s28 = smov 64   ;;  %s1104_s20 = smov 4  }
  0x56   : > { %750 = dma.hbm_to_vmem [thread:$0]  (!%p1209_p11), %s1509_s3, 256, %s1215_s14, [#allocation9], %s1103_s28, %s1103_s28, %s1104_s20  }
  0x57   : > { %s49_s17 = sadd.s32 1, %s1086_s23  ;;  %s40_s19 = sadd.s32 1, %s1094_s25 }
  0x58   : > { %p56_p13 = scmp.ne.s32.totalorder %s1086_s23, %s1082_s22  ;;  %p42_p9 = scmp.ge.s32.totalorder %s40_s19, 2 }
  0x59   : > { %p57_p12 = scmp.eq.s32.totalorder %s1098_s26, 0  ;;  %p1522_p2 = scmp.eq.s32.totalorder %s1179_s27, 1 }
  0x5a   : > { %p768_p4 = scmp.lt.s32.totalorder %s1098_s26, 2  ;;  %s1540_s19 = smov (%p42_p9, %s40_s19), 0 }
  0x5b   : > { %p1295_p1 = por %p1522_p2, %p56_p13  ;;  %p58_p6 = por %p57_p12, %p56_p13 }
  0x5c   : > { %s268_s12 = sand.u32 1, %s1086_s23   ;;  %s44_s10 = ssub.s32 %s1094_s25, %s1540_s19 }
  0x5d   : > { %p47_p8 = scmp.eq.s32.totalorder %s44_s10, 0  ;;  %s685_s14 = sshll.u32 %s268_s12, 3 }
  0x5e   : > { %s686_s13 = sshll.u32 %s1094_s25, 7  ;;  %s272_s20 = scalar_lea.vmem [#allocation2], %s685_s14 }
  0x5f   : > { %s1307_s15 = scalar_select %p47_p8, %s1086_s23, %s49_s17  }
  0x60   : > { %s1312_s28 = scalar_lea.hbm %s1506_s0, %s686_s13  ;;  %s280_s16 = sshll.u32 %s272_s20, 4  ;;  %s1314_s16 = int_to_ptr.vmem [resolvable:$true] %s280_s16 }
  0x61   : > { %p1318_p11 = pnand %p768_p4, %p58_p6  ;;  %s269_s17 = scalar_lea.sflag [#allocation3], %s268_s12 }
  0x62   : > { %s918_s10 = scalar_lea.hbm %s1312_s28, 128  ;;  %s923_s9 = scalar_lea.hbm %s1506_s0, 256 }
  0x63   : > { %p919_p0 = scmp.ne.s32.totalorder %s1312_s28, %s918_s10  ;;  %p920_p3 = pneg %p1318_p11 }
  0x64   : > { %p924_p10 = scmp.lt.u32.totalorder %s1312_s28, %s1506_s0  ;;  %p925_p13 = scmp.lt.u32.totalorder %s923_s9, %s918_s10 }
  0x65   : > { %p921_p5 = pnand %p920_p3, %p919_p0  ;;  %p927_p12 = scmp.lt.u32.totalorder %s918_s10, %s1312_s28 }
  0x66   : > { %p926_p9 = por %p925_p13, %p924_p10 }
  0x67   : > { %p922_p7 = pneg %p921_p5 }
  0x68   : > { %p928_p2 = por %p927_p12, %p926_p9 }
  0x6a   : > { %p929_p4 = pnand %p928_p2, %p922_p7 }
  0x6c   : > { %932 = shalt.err (!%p929_p4)
}
  0x6d   : > { %s933_s12 = scalar_lea.vmem %s1314_s16, 128  ;;  %s1105_s14 = smov [#allocation2]  }
  0x6e   : > { %p934_p6 = scmp.ne.s32.totalorder %s1314_s16, %s933_s12  ;;  %s938_s13 = sshll.u32 %s1105_s14, 4  ;;  %s939_s13 = int_to_ptr.vmem [resolvable:$false] %s938_s13 }
  0x6f   : > { %s940_s11 = scalar_lea.vmem %s939_s13, 256  ;;  %p941_p5 = scmp.lt.s32.totalorder %s1314_s16, %s939_s13 }
  0x70   : > { %p936_p8 = pnand %p934_p6, %p920_p3  ;;  %p942_p10 = scmp.lt.s32.totalorder %s940_s11, %s933_s12 }
  0x72   : > { %p937_p0 = pneg %p936_p8  ;;  %p943_p13 = por %p942_p10, %p941_p5 }
  0x74   : > { %p944_p9 = pnand %p943_p13, %p937_p0 }
  0x76   : > { %947 = shalt.err (!%p944_p9)
}
  0x77   : > { %754 = dma.hbm_to_vmem [thread:$0]  (!%p1318_p11), %s1312_s28, 128, %s1314_s16, %s269_s17  }
  0x78   : > { %p1525_p7 = scmp.ne.s32.totalorder %s1519_s7, 0 }
  0x79   : > { %s1350_s10 = sand.u32 (!%p1525_p7), 1, %s1082_s22   ;;  %p1526_p3 = scmp.ne.s32.totalorder (!%p1525_p7), %s1517_s29, 0 }
  0x7a   : > { %289 = sbr.rel (%p1525_p7) target bundleno = 819 (0x333), region = 36  ;;  %s688_s9 = sshll.u32 (!%p1525_p7), %s1350_s10, 3 }
  0x7b   : > { %s292_s20 = scalar_lea.sflag (!%p1525_p7), [#allocation3], %s1350_s10  ;;  %s295_s12 = scalar_lea.vmem (!%p1525_p7), [#allocation2], %s688_s9 }
  0x81   : > { %1057 = dma.done.wait (%p1526_p3), %s292_s20, 128  }
  0x82   : > { %1059 = vsyncadd (%p1526_p3), %s292_s20, 4294967168  ;;  %p1527_p12 = scmp.eq.s32.totalorder %s1179_s27, 0 }
  0x84   : > { %1061 = dma.done.wait (%p1527_p12), [#allocation6], 32   ;;  %p1528_p11 = pmov %p1527_p12 }
  0x86   : > { %1063 = vsyncadd (%p1528_p11), [#allocation6], 4294967264  ;;  %p1529_p2 = pmov %p1528_p11 }
  0x88   : > { %1065 = dma.done.wait (%p1529_p2), [#allocation9], 256   ;;  %p1530_p4 = pmov %p1529_p2 }
  0x89   : > { %vm350_vm0 = vcmask 261120   ;;  %v347_v0 = vld [vmem:[%s295_s12] sm:$0xff]  ;;  %v830_v7 = vld [vmem:[#allocation8] sm:$0xff]   ;;  %v1106_v8 = vmov 0.0   ;;  %vm1107_vm1 = vmmov 0   ;;  %s1370_s29 = sshll.u32 %s1350_s10, 2 }
  0x8a   : > { %1067 = vsyncadd (%p1530_p4), [#allocation9], 4294967040  ;;  %v351_v1 = vsel %vm350_vm0, %v347_v0, 0.0  ;;  %713 = vmatprep.subr.bf16.mxu0 %v1106_v8  ;;  %v831_v9 = vld [vmem:[#allocation8 + $0x8] sm:$0xff]   ;;  %717 = vmatprep.mubr.msk.bf16.mxu0 %vm1107_vm1, %v1106_v8  ;;  %v695_v14 = vld [vmem:[#allocation5] ss:$0 sm:$0xff] }
  0x8b   : > { %352 = vadd.xlane.f32.xlu0 %v351_v1  ;;  %714 = vmatpush3.bf16.msra.mxu0 %v830_v7  ;;  %v696_v16 = vld [vmem:[#allocation7] ss:$0 sm:$0xff]  ;;  %s1373_s7 = sshll.u32 %s1090_s24, 6  ;;  %s331_s28 = scalar_lea.vmem [#allocation10], %s1370_s29  ;;  %vm440_vm2 = vcmask 257024  }
  0x8c   : > { %715 = vmatprep.subr.bf16.mxu0 %v1106_v8  ;;  %s478_s16 = sshll.u32 %s331_s28, 4  ;;  %s1380_s14 = scalar_lea.hbm %s1510_s4, %s1373_s7  ;;  %s1382_s16 = int_to_ptr.vmem [resolvable:$true] %s478_s16 }
  0x8d   : > { %s1108_s24 = smov 96   ;;  %s454_s13 = scalar_lea.sflag [#allocation4], %s1350_s10 }
  0x8e   : > { %s948_s11 = scalar_lea.vmem %s1382_s16, 64  ;;  %s1109_s9 = smov [#allocation10]  }
  0x8f   : > { %716 = vmatpush3.bf16.msra.mxu0 %v831_v9  ;;  %p949_p6 = scmp.ne.s32.totalorder %s1382_s16, %s948_s11  ;;  %s952_s20 = sshll.u32 %s1109_s9, 4  ;;  %s953_s20 = int_to_ptr.vmem [resolvable:$false] %s952_s20 }
  0x90   : > { %s954_s12 = scalar_lea.vmem %s953_s20, 128  ;;  %p955_p5 = scmp.lt.s32.totalorder %s1382_s16, %s953_s20 }
  0x91   : > { %p950_p8 = pnand %p949_p6, %p1295_p1  ;;  %p956_p10 = scmp.lt.s32.totalorder %s954_s12, %s948_s11 }
  0x93   : > { %p951_p0 = pneg %p950_p8  ;;  %p957_p13 = por %p956_p10, %p955_p5 }
  0x95   : > { %p958_p9 = pnand %p957_p13, %p951_p0 }
 0x118   : > { %v353_v2 = vpop.xlane.xlu0 %352 }
 0x119   : > { %v355_v3 = vmul.f32 0.03125, %v353_v2 }
 0x11b   : > { %v356_v4 = vsub.f32 %v347_v0, %v355_v3 }
 0x11d   : > { %v357_v5 = vmul.f32 %v356_v4, %v356_v4 }
 0x11f   : > { %v358_v6 = vsel %vm350_vm0, %v357_v5, 0.0 }
 0x120   : > { %359 = vadd.xlane.f32.xlu0 %v358_v6 }
 0x1ad   : > { %v360_v10 = vpop.xlane.xlu0 %359 }
 0x1ae   : > { %v361_v11 = vmul.f32 0.03125, %v360_v10 }
 0x1b0   : > { %v362_v12 = vadd.f32 1e-05, %v361_v11 }
 0x1b2   : > { %832 = vrsqrt.f32 %v362_v12 }
 0x1bc   : > { %v833_v13 = vpop.eup %832 }
 0x1bd   : > { %v364_v15 = vmul.f32 %v833_v13, %v356_v4 }
 0x1bf   : > { %v371_v17 = vmul.f32 %v695_v14, %v364_v15 }
 0x1c1   : > { %v378_v18 = vadd.f32 %v696_v16, %v371_v17 }
 0x1c3   : > { %v379_v19 = vpack.c.bf16 %v378_v18, %v378_v18 }
 0x1c5   : > { %718 = vmatmul.mubr.msk.bf16.vlgmr.msra.gmra.mrb[0].mxu0 %vm350_vm0, %v379_v19 }
 0x298   : > { %v433_v20 = vpop.f32.mrb[0].mxu0 }
 0x299   : > { %v439_v21 = vpack.c.bf16 %v433_v20, %v433_v20  ;;  %v719_v22 = vpop.f32.mrb[1].mxu0 }
 0x29a   : > { %v436_v23 = vpop.f32.mrb[2].mxu0 }
 0x29b   : > { %445 = vrot.lane.b32.xlu1 %v439_v21, %s1108_s24  ;;  %v720_v24 = vpop.f32.mrb[3].mxu0  ;;  %441 = vst.msk [vmem:[%s331_s28] sm:$0xf] %vm440_vm2, %v439_v21 }
 0x29c   : > { %961 = shalt.err (!%p958_p9)
}
 0x29d   : > { %s962_s10 = scalar_lea.hbm %s1380_s14, 64  ;;  %s966_s17 = scalar_lea.hbm %s1510_s4, 128 }
 0x29e   : > { %p963_p7 = scmp.ne.s32.totalorder %s1380_s14, %s962_s10  ;;  %p967_p11 = scmp.lt.u32.totalorder %s1380_s14, %s1510_s4 }
 0x29f   : > { %p968_p2 = scmp.lt.u32.totalorder %s966_s17, %s962_s10  ;;  %p970_p6 = scmp.lt.u32.totalorder %s962_s10, %s1380_s14 }
 0x2a0   : > { %p964_p3 = pnand %p963_p7, %p1295_p1 }
 0x2a1   : > { %p969_p4 = por %p968_p2, %p967_p11 }
 0x2a2   : > { %p965_p12 = pneg %p964_p3 }
 0x2a3   : > { %p971_p8 = por %p970_p6, %p969_p4 }
 0x2a5   : > { %p972_p0 = pnand %p971_p8, %p965_p12 }
 0x2a7   : > { %975 = shalt.err (!%p972_p0)
}
 0x2a8   : > { %735 = dma.vmem_to_hbm [thread:$0]  (%p1295_p1), %s1382_s16, 64, %s1380_s14, %s454_s13  }
 0x2a9   : > { %s1110_s11 = smov 64   ;;  %s458_s20 = sand.u32 1, %s1179_s27  }
 0x2aa   : > { %449 = vrot.lane.b32.xlu1 %v439_v21, %s1110_s11  ;;  %s338_s12 = scalar_lea.vmem [#allocation11], %s1370_s29  ;;  %s1413_s17 = scalar_lea.hbm %s1511_s5, %s1373_s7 }
 0x2ab   : > { %s492_s28 = sshll.u32 %s338_s12, 4  ;;  %s345_s24 = scalar_lea.vmem [#allocation13], %s1370_s29  ;;  %s1415_s28 = int_to_ptr.vmem [resolvable:$true] %s492_s28 }
 0x2ac   : > { %s1420_s9 = sshll.u32 %s345_s24, 4  ;;  %s1423_s27 = scalar_lea.sflag [#allocation12], %s458_s20  ;;  %s1454_s9 = int_to_ptr.vmem [resolvable:$true] %s1420_s9 }
 0x2ad   : > { %s976_s16 = scalar_lea.vmem %s1415_s28, 64  ;;  %s1111_s14 = smov [#allocation11]  }
 0x2ae   : > { %p977_p5 = scmp.ne.s32.totalorder %s1415_s28, %s976_s16  ;;  %s980_s13 = sshll.u32 %s1111_s14, 4  ;;  %s981_s13 = int_to_ptr.vmem [resolvable:$false] %s980_s13 }
 0x2af   : > { %s982_s11 = scalar_lea.vmem %s981_s13, 128  ;;  %p983_p9 = scmp.lt.s32.totalorder %s1415_s28, %s981_s13 }
 0x2b0   : > { %p978_p10 = pnand %p977_p5, %p1295_p1  ;;  %p984_p7 = scmp.lt.s32.totalorder %s982_s11, %s976_s16 }
 0x2b2   : > { %p979_p13 = pneg %p978_p10  ;;  %p985_p3 = por %p984_p7, %p983_p9 }
 0x2b4   : > { %p986_p12 = pnand %p985_p3, %p979_p13 }
 0x30d   : > { %v446_v25 = vpop.permute.xlu1 %445 }
 0x30e   : > { %448 = vst.msk [vmem:[%s338_s12] sm:$0xf] %vm440_vm2, %v446_v25 }
 0x30f   : > { %989 = shalt.err (!%p986_p12)
}
 0x310   : > { %s990_s20 = scalar_lea.hbm %s1413_s17, 64  ;;  %s994_s18 = scalar_lea.hbm %s1511_s5, 128 }
 0x311   : > { %p991_p11 = scmp.ne.s32.totalorder %s1413_s17, %s990_s20  ;;  %p995_p6 = scmp.lt.u32.totalorder %s1413_s17, %s1511_s5 }
 0x312   : > { %p996_p8 = scmp.lt.u32.totalorder %s994_s18, %s990_s20  ;;  %p998_p5 = scmp.lt.u32.totalorder %s990_s20, %s1413_s17 }
 0x313   : > { %p992_p2 = pnand %p991_p11, %p1295_p1 }
 0x314   : > { %p997_p0 = por %p996_p8, %p995_p6 }
 0x315   : > { %p993_p4 = pneg %p992_p2 }
 0x316   : > { %p999_p10 = por %p998_p5, %p997_p0 }
 0x318   : > { %p1000_p13 = pnand %p999_p10, %p993_p4 }
 0x31a   : > { %1003 = shalt.err (!%p1000_p13)
}
 0x31b   : > { %736 = dma.vmem_to_hbm [thread:$0]  (%p1295_p1), %s1415_s28, 64, %s1413_s17, %s1423_s27  }
 0x31c   : > { %s1451_s12 = scalar_lea.hbm %s1512_s6, %s1373_s7  ;;  %v450_v26 = vpop.permute.xlu1 %449  ;;  %s1004_s20 = scalar_lea.vmem %s1454_s9, 64 }
 0x31d   : > { %452 = vst.msk [vmem:[%s345_s24] sm:$0xf] %vm440_vm2, %v450_v26  ;;  %p1005_p9 = scmp.ne.s32.totalorder %s1454_s9, %s1004_s20  ;;  %s1112_s28 = smov [#allocation13]  }
 0x31e   : > { %s1008_s17 = sshll.u32 %s1112_s28, 4  ;;  %s1009_s17 = int_to_ptr.vmem [resolvable:$false] %s1008_s17 }
 0x31f   : > { %p1006_p7 = pnand %p1005_p9, %p1295_p1  ;;  %s1010_s10 = scalar_lea.vmem %s1009_s17, 128 }
 0x320   : > { %p1011_p12 = scmp.lt.s32.totalorder %s1454_s9, %s1009_s17  ;;  %p1012_p11 = scmp.lt.s32.totalorder %s1010_s10, %s1004_s20 }
 0x321   : > { %p1007_p3 = pneg %p1006_p7 }
 0x322   : > { %p1013_p2 = por %p1012_p11, %p1011_p12 }
 0x324   : > { %p1014_p4 = pnand %p1013_p2, %p1007_p3 }
 0x326   : > { %1017 = shalt.err (!%p1014_p4)
}
 0x327   : > { %s1018_s29 = scalar_lea.hbm %s1451_s12, 64  ;;  %s1022_s18 = scalar_lea.hbm %s1512_s6, 128 }
 0x328   : > { %p1019_p6 = scmp.ne.s32.totalorder %s1451_s12, %s1018_s29  ;;  %p1023_p5 = scmp.lt.u32.totalorder %s1451_s12, %s1512_s6 }
 0x329   : > { %p1024_p10 = scmp.lt.u32.totalorder %s1022_s18, %s1018_s29  ;;  %p1026_p9 = scmp.lt.u32.totalorder %s1018_s29, %s1451_s12 }
 0x32a   : > { %p1020_p8 = pnand %p1019_p6, %p1295_p1 }
 0x32b   : > { %p1025_p13 = por %p1024_p10, %p1023_p5 }
 0x32c   : > { %p1021_p0 = pneg %p1020_p8 }
 0x32d   : > { %p1027_p7 = por %p1026_p9, %p1025_p13 }
 0x32f   : > { %p1028_p3 = pnand %p1027_p7, %p1021_p0 }
 0x331   : > { %1031 = shalt.err (!%p1028_p3)
}
 0x332   : > { %737 = dma.vmem_to_hbm [thread:$0]  (%p1295_p1), %s1454_s9, 64, %s1451_s12, %s1423_s27  }
 0x333 PF: > { %s518_s16 = sand.u32 1, %s1078_s21   ;;  %p1531_p12 = scmp.ne.s32.totalorder %s1518_s30, 0 }
 0x334   : > { %p1532_p11 = scmp.ge.s32.totalorder %s1098_s26, 2  ;;  %s519_s11 = scalar_lea.sflag [#allocation4], %s518_s16 }
 0x336   : > { %p756_p2 = pnand %p1532_p11, %p1531_p12 }
 0x338   : > { %1069 = dma.done.wait (!%p756_p2), %s519_s11, 64  }
 0x339   : > { %1071 = vsyncadd (!%p756_p2), %s519_s11, 4294967232  ;;  %s1533_s20 = sadd.s32 4294967294, %s1098_s26  }
 0x33a   : > { %s527_s28 = sand.u32 1, %s1533_s20  }
 0x33b   : > { %s528_s17 = scalar_lea.sflag [#allocation12], %s527_s28 }
 0x33c   : > { %1073 = dma.done.wait (!%p756_p2), %s528_s17, 128  }
 0x33d   : > { %1075 = vsyncadd (!%p756_p2), %s528_s17, 4294967168  ;;  %s28_s26 = sadd.s32 1, %s1098_s26   ;;  %s1534_s21 = smov %s1082_s22 }
 0x33e   : > { %p25_p1 = scmp.ge.s32.totalorder %s28_s26, 4   ;;  %s1535_s22 = smov %s1086_s23 }
 0x33f   : > { %s1536_s23 = smov %s1307_s15  ;;  %s1537_s24 = smov %s1094_s25 }
 0x340   : > { %s1538_s25 = smov %s1540_s19  ;;  %27 = sbr.rel (!%p25_p1) target bundleno = 10 (0xa), region = 125 }
 0x347   :  { %542 = vsyncpa [#allocation3], 1 }
 0x348   :  { %544 = vsyncpa [#allocation3 + $0x1], 1 }
 0x349   :  { %545 = vsyncpa [#allocation6], 1 }
 0x34a   :  { %546 = vsyncpa [#allocation9], 1 }
 0x34b   :  { %547 = vsyncpa [#allocation4], 1 }
 0x34c   :  { %549 = vsyncpa [#allocation4 + $0x1], 1 }
 0x34d   :  { %550 = vsyncpa [#allocation12], 1 }
 0x34e   :  { %552 = vsyncpa [#allocation12 + $0x1], 1 }

</bundles_post_ra>
